<compile_context>
chip_gen: v6e
topology: v6e:2x2x1
jax: 0.10.0
libtpu: 0.0.40
codegen_flags: <defaults>
</compile_context>

<pallas_src>
import functools

import jax
import jax.numpy as jnp
from jax.experimental import pallas as pl
from jax.experimental.pallas import tpu as pltpu

LANE = 128      # vreg lane width (last dim)
SUBLANE = 8     # f32 sublane count (second-to-last dim)


def _neg_log_sig(pos, neg, gamma):
    """-log(gamma + sigmoid(pos - neg)) in f32, using the 2-transcendental form."""
    d = pos.astype(jnp.float32) - neg.astype(jnp.float32)
    return -jnp.log(gamma + 0.5 * (jnp.tanh(0.5 * d) + 1.0))


def _sublane_multiple(dtype):
    """Minimum sublane tiling multiple for a dtype (8 f32, 16 bf16/f16, 32 int8)."""
    itemsize = max(1, jnp.dtype(dtype).itemsize)
    return SUBLANE * max(1, 4 // itemsize)


def _default_num_cores():
    """Best-effort TensorCore count per device (1 on v5e/v6e, 2 on megacore parts)."""
    # TODO(synk): switch the core axis to pltpu.CORE_PARALLEL if a v7x profile
    # shows the plain "parallel" axis not landing on both TensorCores.
    try:
        dev = jax.devices()[0]
    except Exception:
        return 1
    for attr in ("num_cores", "core_count", "num_cores_per_chip"):
        v = getattr(dev, attr, None)
        if isinstance(v, int) and v >= 1:
            return min(v, 8)
    return 1


def _bpr_kernel(pos_ref, neg_ref, out_ref, acc_ref, *,
                n_valid, gamma, tile_r, tiles_per_core, may_need_mask):
    c = pl.program_id(0)                 # core-split axis ("parallel")
    t = pl.program_id(1)                 # row-tile / reduction axis ("arbitrary")
    t_last = pl.num_programs(1) - 1

    # Reset the per-core vreg-shaped accumulator at the start of each sweep.
    @pl.when(t == 0)
    def _():
        acc_ref[...] = jnp.zeros_like(acc_ref)

    pos = pos_ref[...].astype(jnp.float32)
    neg = neg_ref[...].astype(jnp.float32)
    diff = pos - neg
    # sigmoid(x) == 0.5*(tanh(0.5*x) + 1): exact, and only 2 EUP ops per
    # element (tanh + log) which stay hidden under the input DMA.
    val = -jnp.log(gamma + 0.5 * (jnp.tanh(0.5 * diff) + 1.0))

    def accumulate(v):
        # (tile_r, 128) -> (tile_r/8, 8, 128) only splits the sublane-major
        # axis (layout no-op); the axis-0 sum is a chain of vreg-wise VPU adds.
        acc_ref[...] += v.reshape(tile_r // SUBLANE, SUBLANE, LANE).sum(axis=0)

    tile_elems = tile_r * LANE
    # Logical (unclamped) flat offset of this tile in the kernel's input view.
    tile_start = (c * tiles_per_core + t) * tile_elems

    if may_need_mask:
        fully_valid = tile_start + tile_elems <= n_valid

        # Fast path: every element of this tile is a real input element.
        @pl.when(fully_valid)
        def _():
            accumulate(val)

        # Slow path (boundary / clamped-duplicate tiles only): select-mask the
        # garbage tail so NaN/Inf from stale rows cannot leak into the sum.
        @pl.when(jnp.logical_not(fully_valid))
        def _():
            row = jax.lax.broadcasted_iota(jnp.int32, val.shape, 0)
            col = jax.lax.broadcasted_iota(jnp.int32, val.shape, 1)
            rem = n_valid - tile_start          # <= 0 for fully-masked duplicates
            accumulate(jnp.where(row * LANE + col < rem, val, 0.0))
    else:
        accumulate(val)

    # Emit this core's (8, 128) partial sums; the single tiny cross-lane
    # reduction + divide-by-N happens once in the wrapper.
    @pl.when(t == t_last)
    def _():
        out_ref[...] = acc_ref[...].reshape(1, SUBLANE, LANE)


def bpr_loss(pos_score, neg_score, gamma=1e-10, tile_r=4096, num_cores=None,
             buffer_count=2):
    assert pos_score.shape == neg_score.shape and pos_score.ndim == 1
    n = pos_score.shape[0]
    if n == 0:
        raise ValueError("BPRLoss requires at least one element (mean of empty).")
    assert n < 2 ** 31, "kernel index math is int32"
    gamma = float(gamma)

    # Keep f32/bf16/f16 streams at native width (halves HBM traffic for 16-bit
    # inputs); anything else is cast to f32 on the host.
    supported = (jnp.float32, jnp.bfloat16, jnp.float16)
    if pos_score.dtype not in supported:
        pos_score = pos_score.astype(jnp.float32)
    if neg_score.dtype not in supported:
        neg_score = neg_score.astype(jnp.float32)
    sub = max(_sublane_multiple(pos_score.dtype), _sublane_multiple(neg_score.dtype))

    if num_cores is None:
        num_cores = _default_num_cores()

    # Lane-aligned head goes through the kernel; the sub-128-element ragged
    # tail (if any) is summed with plain jnp.  No full-array pad: when N is a
    # multiple of 128 the big streams are consumed via a zero-copy reshape.
    n_main = (n // LANE) * LANE
    rows = n_main // LANE

    if rows < sub:
        # Less than one minimum (sublane, 128) tile of work: a single jnp pass
        # is exact and cheaper than a kernel launch.
        return jnp.sum(_neg_log_sig(pos_score, neg_score, gamma)) / jnp.float32(n)

    tail_sum = jnp.float32(0.0)
    if n_main < n:
        tail_sum = jnp.sum(_neg_log_sig(pos_score[n_main:], neg_score[n_main:], gamma))
        # TODO(synk): for huge ragged N this prefix slice still materializes one
        # copy; a fully zero-copy ragged path needs manual DMA from a pl.ANY ref.
        pos_h = pos_score[:n_main]
        neg_h = neg_score[:n_main]
    else:
        pos_h, neg_h = pos_score, neg_score     # zero-copy reshape below

    pos2 = pos_h.reshape(rows, LANE)
    neg2 = neg_h.reshape(rows, LANE)

    # Effective row tile: a multiple of the dtype sublane requirement, as large
    # as requested but no larger than the (rounded-down) row count.  At the
    # default 4096 rows this is 2 MiB/tile/input -> 8 MiB double-buffered VMEM,
    # comfortably under the 32 MiB scoped limit on every generation incl. v7x.
    tile_r_req = max(sub, (int(tile_r) // sub) * sub)
    tile_r_eff = min(tile_r_req, (rows // sub) * sub)
    num_tiles = pl.cdiv(rows, tile_r_eff)
    num_cores_eff = max(1, min(int(num_cores), num_tiles))
    tiles_per_core = pl.cdiv(num_tiles, num_cores_eff)
    assert num_cores_eff * tiles_per_core * tile_r_eff * LANE < 2 ** 31

    # Masking is compiled in only if some tile reaches past the valid rows
    # (partial final tile, or clamped duplicate tiles handed to the last core).
    may_need_mask = (num_tiles * tile_r_eff != rows) or \
                    (num_cores_eff * tiles_per_core > num_tiles)

    kernel = functools.partial(
        _bpr_kernel, n_valid=n_main, gamma=gamma, tile_r=tile_r_eff,
        tiles_per_core=tiles_per_core, may_need_mask=may_need_mask)

    def in_map(c, t):
        # Clamp so trailing (fully-masked) iterations of the last core re-read
        # a valid tile instead of running past the array.
        return (jnp.minimum(c * tiles_per_core + t, num_tiles - 1), 0)

    if buffer_count and int(buffer_count) > 2:
        in_specs = [pl.BlockSpec((tile_r_eff, LANE), in_map,
                                 pipeline_mode=pl.Buffered(int(buffer_count)))
                    for _ in range(2)]
    else:
        in_specs = [pl.BlockSpec((tile_r_eff, LANE), in_map) for _ in range(2)]

    partials = pl.pallas_call(
        kernel,
        out_shape=jax.ShapeDtypeStruct((num_cores_eff, SUBLANE, LANE), jnp.float32),
        grid_spec=pltpu.PrefetchScalarGridSpec(
            num_scalar_prefetch=0,
            grid=(num_cores_eff, tiles_per_core),
            in_specs=in_specs,
            out_specs=pl.BlockSpec((1, SUBLANE, LANE), lambda c, t: (c, 0, 0)),
            scratch_shapes=[pltpu.VMEM((SUBLANE, LANE), jnp.float32)],
        ),
        compiler_params=pltpu.CompilerParams(
            # Core axis shards across TensorCores on multi-core chips; the
            # row-tile axis carries the accumulator, hence "arbitrary".
            dimension_semantics=("parallel", "arbitrary"),
            vmem_limit_bytes=32 * 1024 * 1024,
        ),
    )(pos2, neg2)

    return (jnp.sum(partials) + tail_sum) / jnp.float32(n)


def bpr_loss_ref(pos_score, neg_score, gamma=1e-10):
    return -jnp.mean(
        jnp.log(gamma + jax.nn.sigmoid(pos_score.astype(jnp.float32)
                                       - neg_score.astype(jnp.float32))))


if __name__ == "__main__":
    key = jax.random.PRNGKey(0)
    k_pos, k_neg = jax.random.split(key)

    def check(n, dtype=jnp.float32, rtol=1e-5, **kw):
        pos = jax.random.normal(k_pos, (n,), dtype=jnp.float32).astype(dtype)
        neg = jax.random.normal(k_neg, (n,), dtype=jnp.float32).astype(dtype)
        out = jax.block_until_ready(bpr_loss(pos, neg, **kw))
        ref = jax.block_until_ready(bpr_loss_ref(pos, neg))
        assert jnp.allclose(out, ref, rtol=rtol, atol=1e-6), (n, kw, out, ref)

    # Tiny ragged N: handled exactly by the jnp fallback path.
    check(300)
    # Lane-aligned, zero-copy reshape, single unmasked tile at default tile_r.
    check(8192)
    # Ragged N: host tail sum + partial (masked) final tile + 2-way core split.
    check(5000, tile_r=24, num_cores=2)
    # Odd tile count across 2 cores -> clamped, fully-masked duplicate tile.
    check(3072, tile_r=8, num_cores=2)
    # bf16 streaming: 16-sublane tiling, multiple tiles, in-kernel f32 upcast.
    check(4096, dtype=jnp.bfloat16, tile_r=16)

    print("KERNEL_OK")
</pallas_src>

<mosaic_0001>
module attributes {stable_mosaic.version = 11 : i64} {
  func.func @_bpr_kernel(%arg0: i32, %arg1: i32, %arg2: memref<64x128xf32, #tpu.memory_space<vmem>>, %arg3: memref<64x128xf32, #tpu.memory_space<vmem>>, %arg4: memref<1x8x128xf32, #tpu.memory_space<vmem>>, %arg5: memref<8x128xf32, #tpu.memory_space<vmem>>) attributes {dimension_semantics = [#tpu.dimension_semantics<parallel>, #tpu.dimension_semantics<arbitrary>], iteration_bounds = array<i64: 1, 1>, scalar_prefetch = 0 : i64, scratch_operands = 1 : i64, tpu.core_type = #tpu.core_type<tc>, window_params = [{transform_indices = @transform_0, window_bounds = array<i64: 64, 128>}, {transform_indices = @transform_1, window_bounds = array<i64: 64, 128>}, {transform_indices = @transform_2, window_bounds = array<i64: 1, 8, 128>}]} {
    %c0_i32 = arith.constant 0 : i32
    %0 = arith.cmpi eq, %arg1, %c0_i32 : i32
    %1 = arith.extui %0 : i1 to i32
    %c0_i32_0 = arith.constant 0 : i32
    %2 = arith.cmpi ne, %1, %c0_i32_0 : i32
    scf.if %2 {
      %cst_15 = arith.constant 0.000000e+00 : f32
      %26 = vector.broadcast %cst_15 : f32 to vector<8x128xf32>
      %c0_16 = arith.constant 0 : index
      %c0_17 = arith.constant 0 : index
      %27 = vector.load %arg5[%c0_16, %c0_17] : memref<8x128xf32, #tpu.memory_space<vmem>>, vector<8x128xf32>
      tpu.vector_store %arg5[%c0_16, %c0_17], %26 {strides = array<i32>} : memref<8x128xf32, #tpu.memory_space<vmem>>, vector<8x128xf32>,
    } else {
    }
    %c0 = arith.constant 0 : index
    %c0_1 = arith.constant 0 : index
    %3 = vector.load %arg2[%c0, %c0_1] : memref<64x128xf32, #tpu.memory_space<vmem>>, vector<64x128xf32>
    %c0_2 = arith.constant 0 : index
    %c0_3 = arith.constant 0 : index
    %4 = vector.load %arg3[%c0_2, %c0_3] : memref<64x128xf32, #tpu.memory_space<vmem>>, vector<64x128xf32>
    %5 = arith.subf %3, %4 : vector<64x128xf32>
    %cst = arith.constant 5.000000e-01 : f32
    %6 = vector.broadcast %cst : f32 to vector<64x128xf32>
    %7 = arith.mulf %6, %5 : vector<64x128xf32>
    %8 = math.tanh %7 : vector<64x128xf32>
    %cst_4 = arith.constant 1.000000e+00 : f32
    %9 = vector.broadcast %cst_4 : f32 to vector<64x128xf32>
    %10 = arith.addf %8, %9 : vector<64x128xf32>
    %cst_5 = arith.constant 5.000000e-01 : f32
    %11 = vector.broadcast %cst_5 : f32 to vector<64x128xf32>
    %12 = arith.mulf %11, %10 : vector<64x128xf32>
    %cst_6 = arith.constant 1.000000e-10 : f32
    %13 = vector.broadcast %cst_6 : f32 to vector<64x128xf32>
    %14 = arith.addf %13, %12 : vector<64x128xf32>
    %15 = math.log %14 : vector<64x128xf32>
    %cst_7 = arith.constant 0.000000e+00 : f32
    %16 = vector.broadcast %cst_7 : f32 to vector<64x128xf32>
    %17 = arith.subf %16, %15 : vector<64x128xf32>
    %c0_8 = arith.constant 0 : index
    %c0_9 = arith.constant 0 : index
    %18 = vector.load %arg5[%c0_8, %c0_9] : memref<8x128xf32, #tpu.memory_space<vmem>>, vector<8x128xf32>
    %19 = vector.shape_cast %17 : vector<64x128xf32> to vector<8x8x128xf32>
    %cst_10 = arith.constant dense<0.000000e+00> : vector<8x128xf32>
    %20 = vector.multi_reduction <add>, %19, %cst_10 [0] : vector<8x8x128xf32> to vector<8x128xf32>
    %21 = arith.addf %18, %20 : vector<8x128xf32>
    %c0_11 = arith.constant 0 : index
    %c0_12 = arith.constant 0 : index
    %22 = vector.load %arg5[%c0_11, %c0_12] : memref<8x128xf32, #tpu.memory_space<vmem>>, vector<8x128xf32>
    tpu.vector_store %arg5[%c0_11, %c0_12], %21 {strides = array<i32>} : memref<8x128xf32, #tpu.memory_space<vmem>>, vector<8x128xf32>,
    %c0_i32_13 = arith.constant 0 : i32
    %23 = arith.cmpi eq, %arg1, %c0_i32_13 : i32
    %24 = arith.extui %23 : i1 to i32
    %c0_i32_14 = arith.constant 0 : i32
    %25 = arith.cmpi ne, %24, %c0_i32_14 : i32
    scf.if %25 {
      %c0_15 = arith.constant 0 : index
      %c0_16 = arith.constant 0 : index
      %26 = vector.load %arg5[%c0_15, %c0_16] : memref<8x128xf32, #tpu.memory_space<vmem>>, vector<8x128xf32>
      %27 = vector.shape_cast %26 : vector<8x128xf32> to vector<1x8x128xf32>
      %c0_17 = arith.constant 0 : index
      %c0_18 = arith.constant 0 : index
      %c0_19 = arith.constant 0 : index
      %28 = vector.load %arg4[%c0_17, %c0_18, %c0_19] : memref<1x8x128xf32, #tpu.memory_space<vmem>>, vector<1x8x128xf32>
      tpu.vector_store %arg4[%c0_17, %c0_18, %c0_19], %27 {strides = array<i32>} : memref<1x8x128xf32, #tpu.memory_space<vmem>>, vector<1x8x128xf32>,
    } else {
    }
    return
  }
  func.func @transform_0(%arg0: i32, %arg1: i32) -> (i32, i32) {
    %c1_i32 = arith.constant 1 : i32
    %0 = arith.muli %arg0, %c1_i32 : i32
    %1 = arith.addi %0, %arg1 : i32
    %c0_i32 = arith.constant 0 : i32
    %2 = arith.minsi %1, %c0_i32 : i32
    %c0_i32_0 = arith.constant 0 : i32
    %c0_i32_1 = arith.constant 0 : i32
    return %2, %c0_i32_0 : i32, i32
  }
  func.func @transform_1(%arg0: i32, %arg1: i32) -> (i32, i32) {
    %c1_i32 = arith.constant 1 : i32
    %0 = arith.muli %arg0, %c1_i32 : i32
    %1 = arith.addi %0, %arg1 : i32
    %c0_i32 = arith.constant 0 : i32
    %2 = arith.minsi %1, %c0_i32 : i32
    %c0_i32_0 = arith.constant 0 : i32
    %c0_i32_1 = arith.constant 0 : i32
    return %2, %c0_i32_0 : i32, i32
  }
  func.func @transform_2(%arg0: i32, %arg1: i32) -> (i32, i32, i32) {
    %c0_i32 = arith.constant 0 : i32
    %c0_i32_0 = arith.constant 0 : i32
    %c0_i32_1 = arith.constant 0 : i32
    return %arg0, %c0_i32, %c0_i32_0 : i32, i32, i32
  }
}

</mosaic_0001>

<bundles_post_ra>
// kernel: tpu_custom_call.1
= control target key start
LH: loop header
LB: loop body
LE: loop exit
PB: predicated region body
PF: predicated region fallthrough
CT: control target
= control target key end

     0   :  { %7 = vsyncpa [#allocation4], 0  ;;  %s320_s0 = inlined_call_operand.hbm [shape: f32[64,128], index: 0, kind: input, shape index: {}]   ;;  %s321_s1 = inlined_call_operand.hbm [shape: f32[64,128], index: 1, kind: input, shape index: {}]   ;;  %s322_s2 = inlined_call_operand.hbm [shape: f32[1,8,128], index: 2, kind: output, shape index: {}]  }
   0x1   :  { %8 = vsyncpa [#allocation7], 0 }
   0x2   :  { %9 = vsyncpa [#allocation5], 0  ;;  %s291_s9 = smov [#allocation3]  }
   0x3   :  { %s21_s10 = sshll.u32 %s291_s9, 4  ;;  %s22_s10 = int_to_ptr.vmem [resolvable:$true] %s21_s10 }
   0x4   :  { %s233_s11 = scalar_lea.vmem %s22_s10, 1024  ;;  %p238_p1 = scmp.lt.s32.totalorder %s22_s10, %s22_s10 }
   0x5   :  { %p234_p0 = scmp.ne.s32.totalorder %s22_s10, %s233_s11  ;;  %p239_p2 = scmp.lt.s32.totalorder %s233_s11, %s233_s11 }
   0x7   :  { %p240_p3 = por %p239_p2, %p238_p1 }
   0x9   :  { %p241_p4 = pnand %p240_p3, %p234_p0 }
   0xb   :  { %244 = shalt.err (!%p241_p4)
}
   0xc   :  { %s292_s12 = smov 128   ;;  %s293_s13 = smov 8  }
   0xd   :  { %27 = dma.hbm_to_vmem [thread:$0]  %s320_s0, 1024, %s22_s10, [#allocation4], %s292_s12, %s292_s12, %s293_s13  }
   0xe   :  { %s294_s16 = smov [#allocation6]  }
   0xf   :  { %s39_s17 = sshll.u32 %s294_s16, 4  ;;  %s40_s17 = int_to_ptr.vmem [resolvable:$true] %s39_s17 }
  0x10   :  { %s253_s18 = scalar_lea.vmem %s40_s17, 1024  ;;  %p258_p6 = scmp.lt.s32.totalorder %s40_s17, %s40_s17 }
  0x11   :  { %p254_p5 = scmp.ne.s32.totalorder %s40_s17, %s253_s18  ;;  %p259_p7 = scmp.lt.s32.totalorder %s253_s18, %s253_s18 }
  0x13   :  { %p260_p8 = por %p259_p7, %p258_p6 }
  0x15   :  { %p261_p9 = pnand %p260_p8, %p254_p5 }
  0x17   :  { %264 = shalt.err (!%p261_p9)
}
  0x18   :  { %45 = dma.hbm_to_vmem [thread:$0]  %s321_s1, 1024, %s40_s17, [#allocation7], %s292_s12, %s292_s12, %s293_s13  }
  0x19   :  { %285 = dma.done.wait [#allocation4], 1024  }
  0x1a   :  { %286 = vsyncadd [#allocation4], 4294966272 }
  0x1b   :  { %287 = dma.done.wait [#allocation7], 1024  }
  0x1c   :  { %288 = vsyncadd [#allocation7], 4294966272  ;;  %v65_v0 = vld [vmem:[#allocation3] sm:$0xff]  ;;  %v66_v1 = vld [vmem:[#allocation3 + $0x8] sm:$0xff]  ;;  %s295_s0 = smov [#allocation8]  }
  0x1d   :  { %v67_v2 = vld [vmem:[#allocation3 + $0x10] sm:$0xff]  ;;  %v68_v3 = vld [vmem:[#allocation3 + $0x18] sm:$0xff]  ;;  %v69_v4 = vld [vmem:[#allocation3 + $0x20] sm:$0xff]  ;;  %s174_s1 = sshll.u32 %s295_s0, 4  ;;  %s175_s1 = int_to_ptr.vmem [resolvable:$true] %s174_s1 }
  0x1e   :  { %v70_v5 = vld [vmem:[#allocation3 + $0x28] sm:$0xff]  ;;  %v71_v6 = vld [vmem:[#allocation3 + $0x30] sm:$0xff]  ;;  %v72_v7 = vld [vmem:[#allocation3 + $0x38] sm:$0xff]  ;;  %s265_s21 = scalar_lea.vmem %s175_s1, 128  ;;  %p270_p11 = scmp.lt.s32.totalorder %s175_s1, %s175_s1 }
  0x1f   :  { %v73_v8 = vld [vmem:[#allocation6] sm:$0xff]  ;;  %v74_v9 = vld [vmem:[#allocation6 + $0x8] sm:$0xff]  ;;  %v75_v10 = vld [vmem:[#allocation6 + $0x10] sm:$0xff]  ;;  %p266_p10 = scmp.ne.s32.totalorder %s175_s1, %s265_s21  ;;  %p271_p12 = scmp.lt.s32.totalorder %s265_s21, %s265_s21 }
  0x20   :  { %v76_v11 = vld [vmem:[#allocation6 + $0x18] sm:$0xff]  ;;  %v81_v12 = vsub.f32 %v65_v0, %v73_v8  ;;  %v77_v13 = vld [vmem:[#allocation6 + $0x20] sm:$0xff]  ;;  %v78_v14 = vld [vmem:[#allocation6 + $0x28] sm:$0xff]  ;;  %v82_v16 = vsub.f32 %v66_v1, %v74_v9  ;;  %v83_v17 = vsub.f32 %v67_v2, %v75_v10 }
  0x21   :  { %v79_v15 = vld [vmem:[#allocation6 + $0x30] sm:$0xff]  ;;  %v84_v18 = vsub.f32 %v68_v3, %v76_v11  ;;  %v80_v19 = vld [vmem:[#allocation6 + $0x38] sm:$0xff]  ;;  %v85_v20 = vsub.f32 %v69_v4, %v77_v13  ;;  %v86_v21 = vsub.f32 %v70_v5, %v78_v14  ;;  %p272_p13 = por %p271_p12, %p270_p11 }
  0x22   :  { %v87_v22 = vsub.f32 %v71_v6, %v79_v15  ;;  %v89_v23 = vmul.f32 0.5, %v81_v12  ;;  %v88_v24 = vsub.f32 %v72_v7, %v80_v19  ;;  %v90_v25 = vmul.f32 0.5, %v82_v16 }
  0x23   :  { %v91_v26 = vmul.f32 0.5, %v83_v17  ;;  %v92_v27 = vmul.f32 0.5, %v84_v18  ;;  %v93_v28 = vmul.f32 0.5, %v85_v20  ;;  %v94_v29 = vmul.f32 0.5, %v86_v21  ;;  %p273_p0 = pnand %p272_p13, %p266_p10 }
  0x24   :  { %193 = vtanh.f32 %v89_v23  ;;  %v95_v30 = vmul.f32 0.5, %v87_v22  ;;  %v96_v31 = vmul.f32 0.5, %v88_v24 }
  0x25   :  { %195 = vtanh.f32 %v90_v25 }
  0x26   :  { %197 = vtanh.f32 %v91_v26 }
  0x27   :  { %199 = vtanh.f32 %v92_v27 }
  0x28   :  { %201 = vtanh.f32 %v93_v28 }
  0x29   :  { %203 = vtanh.f32 %v94_v29 }
  0x2a   :  { %205 = vtanh.f32 %v95_v30 }
  0x2b   :  { %207 = vtanh.f32 %v96_v31 }
  0x31   :  { %v194_v32 = vpop.eup %193 }
  0x32   :  { %v196_v33 = vpop.eup %195  ;;  %v105_v34 = vadd.f32 1.0, %v194_v32 }
  0x33   :  { %v198_v35 = vpop.eup %197  ;;  %v106_v36 = vadd.f32 1.0, %v196_v33 }
  0x34   :  { %v200_v37 = vpop.eup %199  ;;  %v107_v38 = vadd.f32 1.0, %v198_v35  ;;  %v113_v39 = vmul.f32 0.5, %v105_v34 }
  0x35   :  { %v202_v40 = vpop.eup %201  ;;  %v108_v41 = vadd.f32 1.0, %v200_v37  ;;  %v114_v42 = vmul.f32 0.5, %v106_v36 }
  0x36   :  { %v204_v43 = vpop.eup %203  ;;  %v109_v44 = vadd.f32 1.0, %v202_v40  ;;  %v115_v45 = vmul.f32 0.5, %v107_v38  ;;  %v121_v46 = vadd.f32 1e-10, %v113_v39 }
  0x37   :  { %v206_v47 = vpop.eup %205  ;;  %v110_v48 = vadd.f32 1.0, %v204_v43  ;;  %v116_v49 = vmul.f32 0.5, %v108_v41  ;;  %v122_v50 = vadd.f32 1e-10, %v114_v42 }
  0x38   :  { %v208_v51 = vpop.eup %207  ;;  %v111_v52 = vadd.f32 1.0, %v206_v47  ;;  %v117_v53 = vmul.f32 0.5, %v109_v44  ;;  %v123_v54 = vadd.f32 1e-10, %v115_v45  ;;  %209 = vlog2.f32 %v121_v46 }
  0x39   :  { %v112_v55 = vadd.f32 1.0, %v208_v51  ;;  %v118_v56 = vmul.f32 0.5, %v110_v48  ;;  %v124_v57 = vadd.f32 1e-10, %v116_v49  ;;  %211 = vlog2.f32 %v122_v50 }
  0x3a   :  { %v119_v58 = vmul.f32 0.5, %v111_v52  ;;  %v125_v59 = vadd.f32 1e-10, %v117_v53  ;;  %213 = vlog2.f32 %v123_v54 }
  0x3b   :  { %v120_v60 = vmul.f32 0.5, %v112_v55  ;;  %v126_v61 = vadd.f32 1e-10, %v118_v56  ;;  %215 = vlog2.f32 %v124_v57 }
  0x3c   :  { %v127_v62 = vadd.f32 1e-10, %v119_v58  ;;  %217 = vlog2.f32 %v125_v59 }
  0x3d   :  { %v128_v63 = vadd.f32 1e-10, %v120_v60  ;;  %219 = vlog2.f32 %v126_v61 }
  0x3e   :  { %221 = vlog2.f32 %v127_v62 }
  0x3f   :  { %223 = vlog2.f32 %v128_v63 }
  0x45   :  { %v210_v0 = vpop.eup %209 }
  0x46   :  { %v212_v1 = vpop.eup %211  ;;  %v130_v2 = vmul.f32 0.6931472, %v210_v0 }
  0x47   :  { %v214_v3 = vpop.eup %213  ;;  %v132_v4 = vmul.f32 0.6931472, %v212_v1 }
  0x48   :  { %v216_v5 = vpop.eup %215  ;;  %v134_v6 = vmul.f32 0.6931472, %v214_v3  ;;  %v145_v7 = vsub.f32 0.0, %v130_v2 }
  0x49   :  { %v218_v8 = vpop.eup %217  ;;  %v136_v9 = vmul.f32 0.6931472, %v216_v5  ;;  %v146_v10 = vsub.f32 0.0, %v132_v4 }
  0x4a   :  { %v220_v11 = vpop.eup %219  ;;  %v138_v12 = vmul.f32 0.6931472, %v218_v8  ;;  %v147_v13 = vsub.f32 0.0, %v134_v6 }
  0x4b   :  { %v222_v14 = vpop.eup %221  ;;  %v140_v15 = vmul.f32 0.6931472, %v220_v11  ;;  %v148_v16 = vsub.f32 0.0, %v136_v9  ;;  %v154_v17 = vadd.f32 %v146_v10, %v145_v7 }
  0x4c   :  { %v224_v18 = vpop.eup %223  ;;  %v142_v19 = vmul.f32 0.6931472, %v222_v14  ;;  %v149_v20 = vsub.f32 0.0, %v138_v12 }
  0x4d   :  { %v155_v21 = vadd.f32 %v154_v17, %v147_v13  ;;  %v144_v22 = vmul.f32 0.6931472, %v224_v18  ;;  %v150_v23 = vsub.f32 0.0, %v140_v15 }
  0x4e   :  { %v151_v25 = vsub.f32 0.0, %v142_v19 }
  0x4f   :  { %v156_v24 = vadd.f32 %v155_v21, %v148_v16  ;;  %v152_v27 = vsub.f32 0.0, %v144_v22 }
  0x51   :  { %v157_v26 = vadd.f32 %v156_v24, %v149_v20 }
  0x53   :  { %v158_v28 = vadd.f32 %v157_v26, %v150_v23 }
  0x55   :  { %v159_v29 = vadd.f32 %v158_v28, %v151_v25 }
  0x57   :  { %v160_v30 = vadd.f32 %v159_v29, %v152_v27 }
  0x59   :  { %167 = vst [vmem:[#allocation8] sm:$0xff] %v160_v30 }
  0x5a   :  { %276 = shalt.err (!%p273_p0)
}
  0x5b   :  { %177 = dma.vmem_to_hbm [thread:$0]  %s175_s1, 128, %s322_s2, [#allocation5]  }
  0x5c   :  { %289 = dma.done.wait [#allocation5], 128  }
  0x5d   :  { %290 = vsyncadd [#allocation5], 4294967168 }
  0x5e   :  { %181 = vsyncpa [#allocation4], 1 }
  0x5f   :  { %182 = vsyncpa [#allocation7], 1 }
  0x60   :  { %183 = vsyncpa [#allocation5], 1 }

</bundles_post_ra>
